<compile_context>
chip_gen: v7x
topology: tpu7x:2x2x1
jax: 0.10.0
libtpu: 0.0.40
codegen_flags: <defaults>
</compile_context>

<pallas_src>
import functools

import jax
import jax.numpy as jnp
from jax.experimental import pallas as pl
from jax.experimental.pallas import tpu as pltpu


def _bottleneck_kernel(W, TR, x_top_ref, x_mid_ref, x_bot_ref,
                       w1_ref, w2_ref, w3_ref,
                       b1_ref, b2_ref, b3_ref, o_ref):
    TRW = TR * W                       # output rows of this tile (flattened)
    MF = (TR + 2) * W                  # rows incl. 1-row halo above and below
    C1 = w1_ref.shape[1]

    j = pl.program_id(1)
    n_tiles = pl.num_programs(1)

    # ---- conv1 (1x1, BN scale folded) + bias + relu on TR rows + halos ------
    x_full = jnp.concatenate(
        [x_top_ref[...], x_mid_ref[...], x_bot_ref[...]], axis=0)   # (MF, Cin) bf16
    out1 = jnp.dot(x_full, w1_ref[...], preferred_element_type=jnp.float32)
    out1 = jnp.maximum(out1 + b1_ref[...], 0.0)                      # (MF, C1) f32

    # ---- conv2 (3x3, stride=1, pad=1): nine accumulating K=C1 matmuls -------
    # dx shifts: sublane rolls of out1; the column mask stands in for the
    # left/right zero padding (and also kills the roll wrap-around rows).
    # Rolls/masks are done in f32 (safe lowering) and cast once per copy.
    colf = jax.lax.broadcasted_iota(jnp.int32, (MF, 1), 0) % W
    zero1 = jnp.zeros_like(out1)
    left = jnp.where(colf >= 1, pltpu.roll(out1, 1, 0), zero1)          # out1[m-1]
    right = jnp.where(colf < W - 1, pltpu.roll(out1, MF - 1, 0), zero1)  # out1[m+1]

    center_bf = out1.astype(jnp.bfloat16)
    left_bf = left.astype(jnp.bfloat16)
    right_bf = right.astype(jnp.bfloat16)

    # dy = +/-1 taps read the halo rows; their contribution is masked on the
    # matmul OUTPUT only where the halo is outside the image (first/last tile).
    row = jax.lax.broadcasted_iota(jnp.int32, (TRW, 1), 0)
    valid_top = jnp.logical_or(j > 0, row >= W)                  # dy = -1 valid
    valid_bot = jnp.logical_or(j < n_tiles - 1, row < TRW - W)   # dy = +1 valid

    acc = jnp.zeros((TRW, C1), jnp.float32)
    for ky, dy in enumerate((-1, 0, 1)):
        base = (1 + dy) * W                              # multiple of W (aligned)
        grp = jnp.zeros((TRW, C1), jnp.float32)
        for kx, src in enumerate((left_bf, center_bf, right_bf)):
            grp = grp + jnp.dot(src[base:base + TRW, :], w2_ref[ky * 3 + kx],
                                preferred_element_type=jnp.float32)
        if dy == -1:
            grp = jnp.where(valid_top, grp, 0.0)
        elif dy == 1:
            grp = jnp.where(valid_bot, grp, 0.0)
        acc = acc + grp
    out2 = jnp.maximum(acc + b2_ref[...], 0.0)                        # (TRW, C1) f32

    # ---- conv3 (1x1, BN scale folded) + bias ---------------------------------
    out3 = jnp.dot(out2.astype(jnp.bfloat16), w3_ref[...],
                   preferred_element_type=jnp.float32) + b3_ref[...]

    # ---- identity residual (downsample=None) + relu --------------------------
    res = x_mid_ref[...].astype(jnp.float32)     # re-read; block is VMEM-resident
    o_ref[...] = jnp.maximum(out3 + res, 0.0).astype(o_ref.dtype)


def _pick_row_tile(H, W, Cin, C1, C4, budget_bytes=4 << 20):
    """Largest row tile whose per-step working set stays small (v7x: 64 MiB VMEM),
    preferring >= 2 row tiles so the DMA pipeline has depth and megacore has work."""
    per_row = W * (4 * Cin + 6 * C4 + 18 * C1)     # rough live bytes per image row
    max_rows = max(1, budget_bytes // max(per_row, 1))
    tr = 1
    for d in range(1, H + 1):
        if H % d == 0 and d <= max_rows:
            tr = d
    if tr == H and H > 1:                          # prefer at least two row tiles
        for d in range(H - 1, 0, -1):
            if H % d == 0:
                tr = d
                break
    return tr


def bottleneck_forward(x_nhwc, params, *, row_tile=None):
    """x_nhwc: (N, H, W, Cin), bf16 (or castable). Returns (N, H, W, 4*planes) bf16."""
    w1, w2, w3, s1, b1, s2, b2, s3, b3 = params
    N, H, W, Cin = x_nhwc.shape
    C1 = w1.shape[1]
    C4 = w3.shape[1]
    assert Cin == C4, "identity residual requires inplanes == planes * 4"

    TR = row_tile if row_tile is not None else _pick_row_tile(H, W, Cin, C1, C4)
    assert H % TR == 0, (H, TR)
    n_tiles = H // TR
    M = H * W
    TRW = TR * W

    # Fold BN (inference) scales into conv weights; bf16 for the MXU.
    w1f = (w1 * s1.reshape(1, C1)).astype(jnp.bfloat16)                   # (Cin, C1)
    w2f = (w2 * s2.reshape(1, 1, 1, C1)).reshape(9, C1, C1)               # (ky*3+kx, cin, cout)
    w2f = w2f.astype(jnp.bfloat16)
    w3f = (w3 * s3.reshape(1, C4)).astype(jnp.bfloat16)                   # (C1, C4)
    b1f = b1.reshape(1, C1).astype(jnp.float32)
    b2f = b2.reshape(1, C1).astype(jnp.float32)
    b3f = b3.reshape(1, C4).astype(jnp.float32)

    x = x_nhwc.astype(jnp.bfloat16).reshape(N, M, Cin)   # free reshape (NHWC is contiguous)

    kernel = functools.partial(_bottleneck_kernel, W, TR)

    flops = 2 * N * M * (Cin * C1 + 9 * C1 * C1 + C1 * C4)
    bytes_accessed = (N * (M + 2 * n_tiles * W) * Cin * 2 + N * M * C4 * 2
                      + (w1f.size + w2f.size + w3f.size) * 2
                      + (b1f.size + b2f.size + b3f.size) * 4)

    out = pl.pallas_call(
        kernel,
        out_shape=jax.ShapeDtypeStruct((N, M, C4), jnp.bfloat16),
        grid=(N, n_tiles),
        in_specs=[
            # one-row halo above (clamped at the image top; contribution masked)
            pl.BlockSpec((None, W, Cin),
                         lambda n, j: (n, jnp.maximum(j * TR - 1, 0), 0)),
            # TR center rows of this tile
            pl.BlockSpec((None, TRW, Cin), lambda n, j: (n, j, 0)),
            # one-row halo below (clamped at the image bottom; contribution masked)
            pl.BlockSpec((None, W, Cin),
                         lambda n, j: (n, jnp.minimum(j * TR + TR, H - 1), 0)),
            pl.BlockSpec(w1f.shape, lambda n, j: (0, 0)),
            pl.BlockSpec(w2f.shape, lambda n, j: (0, 0, 0)),
            pl.BlockSpec(w3f.shape, lambda n, j: (0, 0)),
            pl.BlockSpec(b1f.shape, lambda n, j: (0, 0)),
            pl.BlockSpec(b2f.shape, lambda n, j: (0, 0)),
            pl.BlockSpec(b3f.shape, lambda n, j: (0, 0)),
        ],
        out_specs=pl.BlockSpec((None, TRW, C4), lambda n, j: (n, j, 0)),
        compiler_params=pltpu.CompilerParams(
            dimension_semantics=("parallel", "parallel"),
            vmem_limit_bytes=48 * 1024 * 1024),
        cost_estimate=pl.CostEstimate(flops=flops, transcendentals=0,
                                      bytes_accessed=bytes_accessed),
    )(x, x, x, w1f, w2f, w3f, b1f, b2f, b3f)

    return out.reshape(N, H, W, C4)


def init_params(key, inplanes, planes, eps=1e-5):
    C1, C4 = planes, planes * 4
    ks = jax.random.split(key, 16)
    w1 = jax.random.normal(ks[0], (inplanes, C1), jnp.float32) * 0.05
    w2 = jax.random.normal(ks[1], (3, 3, C1, C1), jnp.float32) * 0.05
    w3 = jax.random.normal(ks[2], (C1, C4), jnp.float32) * 0.05

    def bn(kg, kb, km, kv, C):
        gamma = 1.0 + 0.1 * jax.random.normal(kg, (C,), jnp.float32)
        beta = 0.1 * jax.random.normal(kb, (C,), jnp.float32)
        mean = 0.1 * jax.random.normal(km, (C,), jnp.float32)
        var = jax.random.uniform(kv, (C,), jnp.float32, minval=0.5, maxval=1.5)
        scale = gamma / jnp.sqrt(var + eps)
        bias = beta - mean * scale
        return scale.reshape(1, C), bias.reshape(1, C)

    s1, b1 = bn(ks[3], ks[4], ks[5], ks[6], C1)
    s2, b2 = bn(ks[7], ks[8], ks[9], ks[10], C1)
    s3, b3 = bn(ks[11], ks[12], ks[13], ks[14], C4)
    return (w1, w2, w3, s1, b1, s2, b2, s3, b3)


def reference(x, w1, w2, w3, s1, b1, s2, b2, s3, b3):
    """Plain-JAX (XLA conv, NCHW) reference matching the PyTorch forward."""
    dn = ("NCHW", "OIHW", "NCHW")
    prec = jax.lax.Precision.HIGHEST

    def conv1x1(t, w):                       # w: (cin, cout)
        k = jnp.transpose(w, (1, 0))[:, :, None, None]
        return jax.lax.conv_general_dilated(
            t, k, (1, 1), [(0, 0), (0, 0)], dimension_numbers=dn, precision=prec)

    def conv3x3(t, w):                       # w: (ky, kx, cin, cout)
        k = jnp.transpose(w, (3, 2, 0, 1))
        return jax.lax.conv_general_dilated(
            t, k, (1, 1), [(1, 1), (1, 1)], dimension_numbers=dn, precision=prec)

    def bn(t, s, b):
        return t * s.reshape(1, -1, 1, 1) + b.reshape(1, -1, 1, 1)

    out = jax.nn.relu(bn(conv1x1(x, w1), s1, b1))
    out = jax.nn.relu(bn(conv3x3(out, w2), s2, b2))
    out = bn(conv1x1(out, w3), s3, b3)
    return jax.nn.relu(out + x)


if __name__ == "__main__":
    key = jax.random.PRNGKey(0)
    kx, kp = jax.random.split(key)

    planes = 16
    inplanes = planes * 4        # identity residual (downsample=None)
    N, H, W = 2, 16, 16

    x_nchw = jax.random.normal(kx, (N, inplanes, H, W), jnp.float32)
    params = init_params(kp, inplanes, planes)

    # NHWC / bf16 is the kernel's native layout; a full NHWC ResNet keeps this
    # end-to-end.  The transposes here exist only to match the NCHW PyTorch spec.
    x_nhwc = jnp.transpose(x_nchw, (0, 2, 3, 1)).astype(jnp.bfloat16)

    # row_tile=4 -> 4 row tiles per image: exercises first / interior / last
    # tile halo handling.  (Production shapes would use _pick_row_tile.)
    out_nhwc = bottleneck_forward(x_nhwc, params, row_tile=4)
    out_nhwc = jax.block_until_ready(out_nhwc)

    # Reference sees the same bf16-quantized input.
    x_ref = jnp.transpose(x_nhwc.astype(jnp.float32), (0, 3, 1, 2))
    ref = reference(x_ref, *params)
    out_nchw = jnp.transpose(out_nhwc.astype(jnp.float32), (0, 3, 1, 2))

    assert out_nchw.shape == ref.shape, (out_nchw.shape, ref.shape)
    max_err = float(jnp.max(jnp.abs(out_nchw - ref)))
    # bf16 activations + bf16 MXU matmuls (f32 accumulation) vs f32 HIGHEST reference.
    assert max_err < 6e-2, f"max abs err {max_err}"

    print("KERNEL_OK")
</pallas_src>

<mosaic_0001>
module attributes {stable_mosaic.version = 11 : i64} {
  func.func @_bottleneck_kernel(%arg0: i32, %arg1: i32, %arg2: memref<1x16x64xbf16, #tpu.memory_space<vmem>>, %arg3: memref<1x64x64xbf16, #tpu.memory_space<vmem>>, %arg4: memref<1x16x64xbf16, #tpu.memory_space<vmem>>, %arg5: memref<64x16xbf16, #tpu.memory_space<vmem>>, %arg6: memref<9x16x16xbf16, #tpu.memory_space<vmem>>, %arg7: memref<16x64xbf16, #tpu.memory_space<vmem>>, %arg8: memref<1x16xf32, #tpu.memory_space<vmem>>, %arg9: memref<1x16xf32, #tpu.memory_space<vmem>>, %arg10: memref<1x64xf32, #tpu.memory_space<vmem>>, %arg11: memref<1x64x64xbf16, #tpu.memory_space<vmem>>) attributes {dimension_semantics = [#tpu.dimension_semantics<parallel>, #tpu.dimension_semantics<parallel>], iteration_bounds = array<i64: 2, 4>, scalar_prefetch = 0 : i64, scratch_operands = 0 : i64, tpu.core_type = #tpu.core_type<tc>, window_params = [{transform_indices = @transform_0, window_bounds = array<i64: 1, 16, 64>}, {transform_indices = @transform_1, window_bounds = array<i64: 1, 64, 64>}, {transform_indices = @transform_2, window_bounds = array<i64: 1, 16, 64>}, {pipeline_mode = #tpu.pipeline_mode<synchronous>, transform_indices = @transform_3, window_bounds = array<i64: 64, 16>}, {pipeline_mode = #tpu.pipeline_mode<synchronous>, transform_indices = @transform_4, window_bounds = array<i64: 9, 16, 16>}, {pipeline_mode = #tpu.pipeline_mode<synchronous>, transform_indices = @transform_5, window_bounds = array<i64: 16, 64>}, {pipeline_mode = #tpu.pipeline_mode<synchronous>, transform_indices = @transform_6, window_bounds = array<i64: 1, 16>}, {pipeline_mode = #tpu.pipeline_mode<synchronous>, transform_indices = @transform_7, window_bounds = array<i64: 1, 16>}, {pipeline_mode = #tpu.pipeline_mode<synchronous>, transform_indices = @transform_8, window_bounds = array<i64: 1, 64>}, {transform_indices = @transform_9, window_bounds = array<i64: 1, 64, 64>}]} {
    %c0 = arith.constant 0 : index
    %c0_0 = arith.constant 0 : index
    %c0_1 = arith.constant 0 : index
    %0 = vector.load %arg2[%c0, %c0_0, %c0_1] : memref<1x16x64xbf16, #tpu.memory_space<vmem>>, vector<1x16x64xbf16>
    %1 = vector.shape_cast %0 : vector<1x16x64xbf16> to vector<16x64xbf16>
    %c0_2 = arith.constant 0 : index
    %c0_3 = arith.constant 0 : index
    %c0_4 = arith.constant 0 : index
    %2 = vector.load %arg3[%c0_2, %c0_3, %c0_4] : memref<1x64x64xbf16, #tpu.memory_space<vmem>>, vector<1x64x64xbf16>
    %3 = vector.shape_cast %2 : vector<1x64x64xbf16> to vector<64x64xbf16>
    %c0_5 = arith.constant 0 : index
    %c0_6 = arith.constant 0 : index
    %c0_7 = arith.constant 0 : index
    %4 = vector.load %arg4[%c0_5, %c0_6, %c0_7] : memref<1x16x64xbf16, #tpu.memory_space<vmem>>, vector<1x16x64xbf16>
    %5 = vector.shape_cast %4 : vector<1x16x64xbf16> to vector<16x64xbf16>
    %6 = tpu.concatenate %1, %3, %5 in 0 : vector<16x64xbf16>, vector<64x64xbf16>, vector<16x64xbf16> -> vector<96x64xbf16>
    %c0_8 = arith.constant 0 : index
    %c0_9 = arith.constant 0 : index
    %7 = vector.load %arg5[%c0_8, %c0_9] : memref<64x16xbf16, #tpu.memory_space<vmem>>, vector<64x16xbf16>
    %cst = arith.constant dense<0.000000e+00> : vector<96x16xf32>
    %8 = tpu.matmul %6, %7, %cst {dimension_numbers = #tpu.dot_dimension_numbers<[1], [0], [0], [1], [0, 0, 1, 1], [], []>} : vector<96x64xbf16>, vector<64x16xbf16>, vector<96x16xf32> -> vector<96x16xf32>
    %c0_10 = arith.constant 0 : index
    %c0_11 = arith.constant 0 : index
    %9 = vector.load %arg8[%c0_10, %c0_11] : memref<1x16xf32, #tpu.memory_space<vmem>>, vector<1x16xf32>
    %10 = vector.broadcast %9 : vector<1x16xf32> to vector<96x16xf32>
    %11 = arith.addf %8, %10 : vector<96x16xf32>
    %cst_12 = arith.constant 0.000000e+00 : f32
    %12 = vector.broadcast %cst_12 : f32 to vector<96x16xf32>
    %13 = arith.maximumf %11, %12 : vector<96x16xf32>
    %14 = tpu.iota {dimensions = array<i32: 0>} : vector<96x1xi32>
    %c16_i32 = arith.constant 16 : i32
    %c0_i32 = arith.constant 0 : i32
    %15 = arith.cmpi eq, %c16_i32, %c0_i32 : i32
    %c1_i32 = arith.constant 1 : i32
    %16 = arith.select %15, %c1_i32, %c16_i32 : i32
    %17 = vector.broadcast %16 : i32 to vector<96x1xi32>
    %18 = arith.remsi %14, %17 : vector<96x1xi32>
    %c0_i32_13 = arith.constant 0 : i32
    %19 = vector.broadcast %c0_i32_13 : i32 to vector<96x1xi32>
    %20 = arith.cmpi ne, %18, %19 : vector<96x1xi32>
    %c0_i32_14 = arith.constant 0 : i32
    %21 = vector.broadcast %c0_i32_14 : i32 to vector<96x1xi32>
    %22 = arith.cmpi slt, %18, %21 : vector<96x1xi32>
    %c0_i32_15 = arith.constant 0 : i32
    %23 = arith.cmpi slt, %16, %c0_i32_15 : i32
    %24 = vector.broadcast %23 : i1 to vector<96x1xi1>
    %25 = vector.broadcast %24 : vector<96x1xi1> to vector<96x1xi1>
    %26 = arith.xori %22, %25 : vector<96x1xi1>
    %27 = arith.andi %26, %20 : vector<96x1xi1>
    %28 = vector.broadcast %16 : i32 to vector<96x1xi32>
    %29 = arith.addi %18, %28 : vector<96x1xi32>
    %30 = arith.select %27, %29, %18 : vector<96x1xi1>, vector<96x1xi32>
    %cst_16 = arith.constant 0.000000e+00 : f32
    %31 = vector.broadcast %cst_16 : f32 to vector<96x16xf32>
    %c1_i32_17 = arith.constant 1 : i32
    %32 = vector.broadcast %c1_i32_17 : i32 to vector<96x1xi32>
    %33 = arith.cmpi sge, %30, %32 : vector<96x1xi32>
    %c1_i32_18 = arith.constant 1 : i32
    %34 = tpu.dynamic_rotate %13 by %c1_i32_18 dim 0 : vector<96x16xf32>, i32 -> vector<96x16xf32>
    %35 = vector.shape_cast %33 : vector<96x1xi1> to vector<96x1xi1>
    %36 = vector.broadcast %35 : vector<96x1xi1> to vector<96x16xi1>
    %37 = arith.select %36, %34, %31 : vector<96x16xi1>, vector<96x16xf32>
    %c15_i32 = arith.constant 15 : i32
    %38 = vector.broadcast %c15_i32 : i32 to vector<96x1xi32>
    %39 = arith.cmpi slt, %30, %38 : vector<96x1xi32>
    %c95_i32 = arith.constant 95 : i32
    %40 = tpu.dynamic_rotate %13 by %c95_i32 dim 0 : vector<96x16xf32>, i32 -> vector<96x16xf32>
    %41 = vector.shape_cast %39 : vector<96x1xi1> to vector<96x1xi1>
    %42 = vector.broadcast %41 : vector<96x1xi1> to vector<96x16xi1>
    %43 = arith.select %42, %40, %31 : vector<96x16xi1>, vector<96x16xf32>
    %44 = arith.truncf %13 : vector<96x16xf32> to vector<96x16xbf16>
    %45 = arith.truncf %37 : vector<96x16xf32> to vector<96x16xbf16>
    %46 = arith.truncf %43 : vector<96x16xf32> to vector<96x16xbf16>
    %47 = tpu.iota {dimensions = array<i32: 0>} : vector<64x1xi32>
    %c0_i32_19 = arith.constant 0 : i32
    %48 = arith.cmpi sgt, %arg1, %c0_i32_19 : i32
    %c16_i32_20 = arith.constant 16 : i32
    %49 = vector.broadcast %c16_i32_20 : i32 to vector<64x1xi32>
    %50 = arith.cmpi sge, %47, %49 : vector<64x1xi32>
    %51 = vector.broadcast %48 : i1 to vector<64x1xi1>
    %52 = arith.ori %51, %50 : vector<64x1xi1>
    %c3_i32 = arith.constant 3 : i32
    %53 = arith.cmpi slt, %arg1, %c3_i32 : i32
    %c48_i32 = arith.constant 48 : i32
    %54 = vector.broadcast %c48_i32 : i32 to vector<64x1xi32>
    %55 = arith.cmpi slt, %47, %54 : vector<64x1xi32>
    %56 = vector.broadcast %53 : i1 to vector<64x1xi1>
    %57 = arith.ori %56, %55 : vector<64x1xi1>
    %cst_21 = arith.constant 0.000000e+00 : f32
    %58 = vector.broadcast %cst_21 : f32 to vector<64x16xf32>
    %cst_22 = arith.constant 0.000000e+00 : f32
    %59 = vector.broadcast %cst_22 : f32 to vector<64x16xf32>
    %60 = vector.extract_strided_slice %45 {offsets = [0, 0], sizes = [64, 16], strides = [1, 1]} : vector<96x16xbf16> to vector<64x16xbf16>
    %c0_23 = arith.constant 0 : index
    %c0_24 = arith.constant 0 : index
    %c0_25 = arith.constant 0 : index
    %61 = vector.load %arg6[%c0_23, %c0_24, %c0_25] : memref<9x16x16xbf16, #tpu.memory_space<vmem>>, vector<1x16x16xbf16>
    %62 = vector.shape_cast %61 : vector<1x16x16xbf16> to vector<16x16xbf16>
    %cst_26 = arith.constant dense<0.000000e+00> : vector<64x16xf32>
    %63 = tpu.matmul %60, %62, %cst_26 {dimension_numbers = #tpu.dot_dimension_numbers<[1], [0], [0], [1], [0, 0, 1, 1], [], []>} : vector<64x16xbf16>, vector<16x16xbf16>, vector<64x16xf32> -> vector<64x16xf32>
    %64 = arith.addf %59, %63 : vector<64x16xf32>
    %65 = vector.extract_strided_slice %44 {offsets = [0, 0], sizes = [64, 16], strides = [1, 1]} : vector<96x16xbf16> to vector<64x16xbf16>
    %c1 = arith.constant 1 : index
    %c0_27 = arith.constant 0 : index
    %c0_28 = arith.constant 0 : index
    %66 = vector.load %arg6[%c1, %c0_27, %c0_28] : memref<9x16x16xbf16, #tpu.memory_space<vmem>>, vector<1x16x16xbf16>
    %67 = vector.shape_cast %66 : vector<1x16x16xbf16> to vector<16x16xbf16>
    %cst_29 = arith.constant dense<0.000000e+00> : vector<64x16xf32>
    %68 = tpu.matmul %65, %67, %cst_29 {dimension_numbers = #tpu.dot_dimension_numbers<[1], [0], [0], [1], [0, 0, 1, 1], [], []>} : vector<64x16xbf16>, vector<16x16xbf16>, vector<64x16xf32> -> vector<64x16xf32>
    %69 = arith.addf %64, %68 : vector<64x16xf32>
    %70 = vector.extract_strided_slice %46 {offsets = [0, 0], sizes = [64, 16], strides = [1, 1]} : vector<96x16xbf16> to vector<64x16xbf16>
    %c2 = arith.constant 2 : index
    %c0_30 = arith.constant 0 : index
    %c0_31 = arith.constant 0 : index
    %71 = vector.load %arg6[%c2, %c0_30, %c0_31] : memref<9x16x16xbf16, #tpu.memory_space<vmem>>, vector<1x16x16xbf16>
    %72 = vector.shape_cast %71 : vector<1x16x16xbf16> to vector<16x16xbf16>
    %cst_32 = arith.constant dense<0.000000e+00> : vector<64x16xf32>
    %73 = tpu.matmul %70, %72, %cst_32 {dimension_numbers = #tpu.dot_dimension_numbers<[1], [0], [0], [1], [0, 0, 1, 1], [], []>} : vector<64x16xbf16>, vector<16x16xbf16>, vector<64x16xf32> -> vector<64x16xf32>
    %74 = arith.addf %69, %73 : vector<64x16xf32>
    %cst_33 = arith.constant 0.000000e+00 : f32
    %75 = vector.shape_cast %52 : vector<64x1xi1> to vector<64x1xi1>
    %76 = vector.broadcast %75 : vector<64x1xi1> to vector<64x16xi1>
    %77 = vector.broadcast %cst_33 : f32 to vector<64x16xf32>
    %78 = arith.select %76, %74, %77 : vector<64x16xi1>, vector<64x16xf32>
    %79 = arith.addf %58, %78 : vector<64x16xf32>
    %cst_34 = arith.constant 0.000000e+00 : f32
    %80 = vector.broadcast %cst_34 : f32 to vector<64x16xf32>
    %81 = vector.extract_strided_slice %45 {offsets = [16, 0], sizes = [64, 16], strides = [1, 1]} : vector<96x16xbf16> to vector<64x16xbf16>
    %c3 = arith.constant 3 : index
    %c0_35 = arith.constant 0 : index
    %c0_36 = arith.constant 0 : index
    %82 = vector.load %arg6[%c3, %c0_35, %c0_36] : memref<9x16x16xbf16, #tpu.memory_space<vmem>>, vector<1x16x16xbf16>
    %83 = vector.shape_cast %82 : vector<1x16x16xbf16> to vector<16x16xbf16>
    %cst_37 = arith.constant dense<0.000000e+00> : vector<64x16xf32>
    %84 = tpu.matmul %81, %83, %cst_37 {dimension_numbers = #tpu.dot_dimension_numbers<[1], [0], [0], [1], [0, 0, 1, 1], [], []>} : vector<64x16xbf16>, vector<16x16xbf16>, vector<64x16xf32> -> vector<64x16xf32>
    %85 = arith.addf %80, %84 : vector<64x16xf32>
    %86 = vector.extract_strided_slice %44 {offsets = [16, 0], sizes = [64, 16], strides = [1, 1]} : vector<96x16xbf16> to vector<64x16xbf16>
    %c4 = arith.constant 4 : index
    %c0_38 = arith.constant 0 : index
    %c0_39 = arith.constant 0 : index
    %87 = vector.load %arg6[%c4, %c0_38, %c0_39] : memref<9x16x16xbf16, #tpu.memory_space<vmem>>, vector<1x16x16xbf16>
    %88 = vector.shape_cast %87 : vector<1x16x16xbf16> to vector<16x16xbf16>
    %cst_40 = arith.constant dense<0.000000e+00> : vector<64x16xf32>
    %89 = tpu.matmul %86, %88, %cst_40 {dimension_numbers = #tpu.dot_dimension_numbers<[1], [0], [0], [1], [0, 0, 1, 1], [], []>} : vector<64x16xbf16>, vector<16x16xbf16>, vector<64x16xf32> -> vector<64x16xf32>
    %90 = arith.addf %85, %89 : vector<64x16xf32>
    %91 = vector.extract_strided_slice %46 {offsets = [16, 0], sizes = [64, 16], strides = [1, 1]} : vector<96x16xbf16> to vector<64x16xbf16>
    %c5 = arith.constant 5 : index
    %c0_41 = arith.constant 0 : index
    %c0_42 = arith.constant 0 : index
    %92 = vector.load %arg6[%c5, %c0_41, %c0_42] : memref<9x16x16xbf16, #tpu.memory_space<vmem>>, vector<1x16x16xbf16>
    %93 = vector.shape_cast %92 : vector<1x16x16xbf16> to vector<16x16xbf16>
    %cst_43 = arith.constant dense<0.000000e+00> : vector<64x16xf32>
    %94 = tpu.matmul %91, %93, %cst_43 {dimension_numbers = #tpu.dot_dimension_numbers<[1], [0], [0], [1], [0, 0, 1, 1], [], []>} : vector<64x16xbf16>, vector<16x16xbf16>, vector<64x16xf32> -> vector<64x16xf32>
    %95 = arith.addf %90, %94 : vector<64x16xf32>
    %96 = arith.addf %79, %95 : vector<64x16xf32>
    %cst_44 = arith.constant 0.000000e+00 : f32
    %97 = vector.broadcast %cst_44 : f32 to vector<64x16xf32>
    %98 = vector.extract_strided_slice %45 {offsets = [32, 0], sizes = [64, 16], strides = [1, 1]} : vector<96x16xbf16> to vector<64x16xbf16>
    %c6 = arith.constant 6 : index
    %c0_45 = arith.constant 0 : index
    %c0_46 = arith.constant 0 : index
    %99 = vector.load %arg6[%c6, %c0_45, %c0_46] : memref<9x16x16xbf16, #tpu.memory_space<vmem>>, vector<1x16x16xbf16>
    %100 = vector.shape_cast %99 : vector<1x16x16xbf16> to vector<16x16xbf16>
    %cst_47 = arith.constant dense<0.000000e+00> : vector<64x16xf32>
    %101 = tpu.matmul %98, %100, %cst_47 {dimension_numbers = #tpu.dot_dimension_numbers<[1], [0], [0], [1], [0, 0, 1, 1], [], []>} : vector<64x16xbf16>, vector<16x16xbf16>, vector<64x16xf32> -> vector<64x16xf32>
    %102 = arith.addf %97, %101 : vector<64x16xf32>
    %103 = vector.extract_strided_slice %44 {offsets = [32, 0], sizes = [64, 16], strides = [1, 1]} : vector<96x16xbf16> to vector<64x16xbf16>
    %c7 = arith.constant 7 : index
    %c0_48 = arith.constant 0 : index
    %c0_49 = arith.constant 0 : index
    %104 = vector.load %arg6[%c7, %c0_48, %c0_49] : memref<9x16x16xbf16, #tpu.memory_space<vmem>>, vector<1x16x16xbf16>
    %105 = vector.shape_cast %104 : vector<1x16x16xbf16> to vector<16x16xbf16>
    %cst_50 = arith.constant dense<0.000000e+00> : vector<64x16xf32>
    %106 = tpu.matmul %103, %105, %cst_50 {dimension_numbers = #tpu.dot_dimension_numbers<[1], [0], [0], [1], [0, 0, 1, 1], [], []>} : vector<64x16xbf16>, vector<16x16xbf16>, vector<64x16xf32> -> vector<64x16xf32>
    %107 = arith.addf %102, %106 : vector<64x16xf32>
    %108 = vector.extract_strided_slice %46 {offsets = [32, 0], sizes = [64, 16], strides = [1, 1]} : vector<96x16xbf16> to vector<64x16xbf16>
    %c8 = arith.constant 8 : index
    %c0_51 = arith.constant 0 : index
    %c0_52 = arith.constant 0 : index
    %109 = vector.load %arg6[%c8, %c0_51, %c0_52] : memref<9x16x16xbf16, #tpu.memory_space<vmem>>, vector<1x16x16xbf16>
    %110 = vector.shape_cast %109 : vector<1x16x16xbf16> to vector<16x16xbf16>
    %cst_53 = arith.constant dense<0.000000e+00> : vector<64x16xf32>
    %111 = tpu.matmul %108, %110, %cst_53 {dimension_numbers = #tpu.dot_dimension_numbers<[1], [0], [0], [1], [0, 0, 1, 1], [], []>} : vector<64x16xbf16>, vector<16x16xbf16>, vector<64x16xf32> -> vector<64x16xf32>
    %112 = arith.addf %107, %111 : vector<64x16xf32>
    %cst_54 = arith.constant 0.000000e+00 : f32
    %113 = vector.shape_cast %57 : vector<64x1xi1> to vector<64x1xi1>
    %114 = vector.broadcast %113 : vector<64x1xi1> to vector<64x16xi1>
    %115 = vector.broadcast %cst_54 : f32 to vector<64x16xf32>
    %116 = arith.select %114, %112, %115 : vector<64x16xi1>, vector<64x16xf32>
    %117 = arith.addf %96, %116 : vector<64x16xf32>
    %c0_55 = arith.constant 0 : index
    %c0_56 = arith.constant 0 : index
    %118 = vector.load %arg9[%c0_55, %c0_56] : memref<1x16xf32, #tpu.memory_space<vmem>>, vector<1x16xf32>
    %119 = vector.broadcast %118 : vector<1x16xf32> to vector<64x16xf32>
    %120 = arith.addf %117, %119 : vector<64x16xf32>
    %cst_57 = arith.constant 0.000000e+00 : f32
    %121 = vector.broadcast %cst_57 : f32 to vector<64x16xf32>
    %122 = arith.maximumf %120, %121 : vector<64x16xf32>
    %123 = arith.truncf %122 : vector<64x16xf32> to vector<64x16xbf16>
    %c0_58 = arith.constant 0 : index
    %c0_59 = arith.constant 0 : index
    %124 = vector.load %arg7[%c0_58, %c0_59] : memref<16x64xbf16, #tpu.memory_space<vmem>>, vector<16x64xbf16>
    %cst_60 = arith.constant dense<0.000000e+00> : vector<64x64xf32>
    %125 = tpu.matmul %123, %124, %cst_60 {dimension_numbers = #tpu.dot_dimension_numbers<[1], [0], [0], [1], [0, 0, 1, 1], [], []>} : vector<64x16xbf16>, vector<16x64xbf16>, vector<64x64xf32> -> vector<64x64xf32>
    %c0_61 = arith.constant 0 : index
    %c0_62 = arith.constant 0 : index
    %126 = vector.load %arg10[%c0_61, %c0_62] : memref<1x64xf32, #tpu.memory_space<vmem>>, vector<1x64xf32>
    %127 = vector.broadcast %126 : vector<1x64xf32> to vector<64x64xf32>
    %128 = arith.addf %125, %127 : vector<64x64xf32>
    %c0_63 = arith.constant 0 : index
    %c0_64 = arith.constant 0 : index
    %c0_65 = arith.constant 0 : index
    %129 = vector.load %arg3[%c0_63, %c0_64, %c0_65] : memref<1x64x64xbf16, #tpu.memory_space<vmem>>, vector<1x64x64xbf16>
    %130 = vector.shape_cast %129 : vector<1x64x64xbf16> to vector<64x64xbf16>
    %131 = arith.extf %130 : vector<64x64xbf16> to vector<64x64xf32>
    %132 = arith.addf %128, %131 : vector<64x64xf32>
    %cst_66 = arith.constant 0.000000e+00 : f32
    %133 = vector.broadcast %cst_66 : f32 to vector<64x64xf32>
    %134 = arith.maximumf %132, %133 : vector<64x64xf32>
    %135 = arith.truncf %134 : vector<64x64xf32> to vector<64x64xbf16>
    %c0_67 = arith.constant 0 : index
    %c0_68 = arith.constant 0 : index
    %c0_69 = arith.constant 0 : index
    %136 = vector.load %arg11[%c0_67, %c0_68, %c0_69] : memref<1x64x64xbf16, #tpu.memory_space<vmem>>, vector<1x64x64xbf16>
    %137 = vector.shape_cast %136 : vector<1x64x64xbf16> to vector<64x64xbf16>
    %138 = vector.shape_cast %135 : vector<64x64xbf16> to vector<1x64x64xbf16>
    tpu.vector_store %arg11[%c0_67, %c0_68, %c0_69], %138 {strides = array<i32>} : memref<1x64x64xbf16, #tpu.memory_space<vmem>>, vector<1x64x64xbf16>,
    return
  }
  func.func @transform_0(%arg0: i32, %arg1: i32) -> (i32, i32, i32) {
    %c4_i32 = arith.constant 4 : i32
    %0 = arith.muli %arg1, %c4_i32 : i32
    %c1_i32 = arith.constant 1 : i32
    %1 = arith.subi %0, %c1_i32 : i32
    %c0_i32 = arith.constant 0 : i32
    %2 = arith.maxsi %1, %c0_i32 : i32
    %c0_i32_0 = arith.constant 0 : i32
    %c0_i32_1 = arith.constant 0 : i32
    return %arg0, %2, %c0_i32_0 : i32, i32, i32
  }
  func.func @transform_1(%arg0: i32, %arg1: i32) -> (i32, i32, i32) {
    %c0_i32 = arith.constant 0 : i32
    %c0_i32_0 = arith.constant 0 : i32
    return %arg0, %arg1, %c0_i32 : i32, i32, i32
  }
  func.func @transform_2(%arg0: i32, %arg1: i32) -> (i32, i32, i32) {
    %c4_i32 = arith.constant 4 : i32
    %0 = arith.muli %arg1, %c4_i32 : i32
    %c4_i32_0 = arith.constant 4 : i32
    %1 = arith.addi %0, %c4_i32_0 : i32
    %c15_i32 = arith.constant 15 : i32
    %2 = arith.minsi %1, %c15_i32 : i32
    %c0_i32 = arith.constant 0 : i32
    %c0_i32_1 = arith.constant 0 : i32
    return %arg0, %2, %c0_i32 : i32, i32, i32
  }
  func.func @transform_3(%arg0: i32, %arg1: i32) -> (i32, i32) {
    %c0_i32 = arith.constant 0 : i32
    %c0_i32_0 = arith.constant 0 : i32
    %c0_i32_1 = arith.constant 0 : i32
    return %c0_i32, %c0_i32_0 : i32, i32
  }
  func.func @transform_4(%arg0: i32, %arg1: i32) -> (i32, i32, i32) {
    %c0_i32 = arith.constant 0 : i32
    %c0_i32_0 = arith.constant 0 : i32
    %c0_i32_1 = arith.constant 0 : i32
    %c0_i32_2 = arith.constant 0 : i32
    return %c0_i32, %c0_i32_0, %c0_i32_1 : i32, i32, i32
  }
  func.func @transform_5(%arg0: i32, %arg1: i32) -> (i32, i32) {
    %c0_i32 = arith.constant 0 : i32
    %c0_i32_0 = arith.constant 0 : i32
    %c0_i32_1 = arith.constant 0 : i32
    return %c0_i32, %c0_i32_0 : i32, i32
  }
  func.func @transform_6(%arg0: i32, %arg1: i32) -> (i32, i32) {
    %c0_i32 = arith.constant 0 : i32
    %c0_i32_0 = arith.constant 0 : i32
    %c0_i32_1 = arith.constant 0 : i32
    return %c0_i32, %c0_i32_0 : i32, i32
  }
  func.func @transform_7(%arg0: i32, %arg1: i32) -> (i32, i32) {
    %c0_i32 = arith.constant 0 : i32
    %c0_i32_0 = arith.constant 0 : i32
    %c0_i32_1 = arith.constant 0 : i32
    return %c0_i32, %c0_i32_0 : i32, i32
  }
  func.func @transform_8(%arg0: i32, %arg1: i32) -> (i32, i32) {
    %c0_i32 = arith.constant 0 : i32
    %c0_i32_0 = arith.constant 0 : i32
    %c0_i32_1 = arith.constant 0 : i32
    return %c0_i32, %c0_i32_0 : i32, i32
  }
  func.func @transform_9(%arg0: i32, %arg1: i32) -> (i32, i32, i32) {
    %c0_i32 = arith.constant 0 : i32
    %c0_i32_0 = arith.constant 0 : i32
    return %arg0, %arg1, %c0_i32 : i32, i32, i32
  }
}

</mosaic_0001>

<bundles_post_ra>
// kernel: tpu_custom_call.1
= control target key start
LH: loop header
LB: loop body
LE: loop exit
PB: predicated region body
PF: predicated region fallthrough
CT: control target
= control target key end

     0   :  { %s2696_s30 = smov 0   ;;  %s2698_s10 = smov 0   ;;  %s3181_s0 = inlined_call_operand.vmem [shape: bf16[2,256,64], index: 0, kind: input, shape index: {}]   ;;  %s3182_s1 = inlined_call_operand.vmem [shape: bf16[2,256,64], index: 1, kind: input, shape index: {}]   ;;  %s3183_s2 = inlined_call_operand.vmem [shape: bf16[2,256,64], index: 2, kind: input, shape index: {}]   ;;  %s3184_s3 = inlined_call_operand.vmem [shape: bf16[64,16], index: 3, kind: input, shape index: {}]   ;;  %s3185_s4 = inlined_call_operand.vmem [shape: bf16[9,16,16], index: 4, kind: input, shape index: {}]   ;;  %s3186_s5 = inlined_call_operand.vmem [shape: bf16[16,64], index: 5, kind: input, shape index: {}]   ;;  %s3187_s6 = inlined_call_operand.vmem [shape: f32[1,16], index: 6, kind: input, shape index: {}]   ;;  %s3188_s7 = inlined_call_operand.vmem [shape: f32[1,16], index: 7, kind: input, shape index: {}]   ;;  %s3189_s8 = inlined_call_operand.vmem [shape: f32[1,64], index: 8, kind: input, shape index: {}]   ;;  %s3190_s9 = inlined_call_operand.vmem [shape: bf16[2,256,64], index: 9, kind: output, shape index: {}]  }
   0x1   :  { %s2700_s11 = smov 0   ;;  %s2702_s12 = smov 0  }
   0x2   :  { %s2704_s13 = smov 0  }
   0x3 LB: > { %s28_s14 = sadd.s32 1, %s2636_s11  ;;  %s31_s15 = sadd.s32 1, %s2640_s12  ;;  %s2644_s13 = sphi %s2704_s13, %s19_s13   ;;  %s2640_s12 = sphi %s2702_s12, %s3220_s12   ;;  %s2636_s11 = sphi %s2700_s11, %s3219_s11   ;;  %s2632_s10 = sphi %s2698_s10, %s3218_s10   ;;  %s2628_s30 = sphi %s2696_s30, %s3217_s30  }
   0x4   : > { %p29_p0 = scmp.ge.s32.totalorder %s28_s14, 4  ;;  %p2191_p1 = scmp.ge.s32.totalorder %s2644_s13, 1 }
   0x5   : > { %p374_p2 = scmp.lt.s32.totalorder %s2644_s13, 9 }
   0x6   : > { %s3222_s14 = smov (%p29_p0, %s28_s14), 0  ;;  %s3224_s15 = smov (!%p29_p0, %s31_s15), %s2640_s12 }
   0x7   : > { %p375_p3 = pnand %p2191_p1, %p374_p2  ;;  %p33_p4 = scmp.ge.s32.totalorder %s3224_s15, 2 }
   0x8   : > { %v2582_v0 = vld [vmem:[%s3184_s3] sm:$0xff] (!%p375_p3)   ;;  %s2192_s18 = sshll.u32 (!%p375_p3), %s2628_s30, 2  ;;  %v2583_v1 = vld [vmem:[%s3184_s3 + $0x8] sm:$0xff] (!%p375_p3)   ;;  %p449_p6 = scmp.lt.s32.totalorder (!%p375_p3), %s2632_s10, 1  ;;  %v2584_v2 = vld [vmem:[%s3184_s3 + $0x10] sm:$0xff] (!%p375_p3)   ;;  %vm582_vm0 = vcmask (!%p375_p3), 523264   ;;  %v694_v14 = vlaneseq (!%p375_p3) }
   0x9   : > { %s3226_s15 = smov (%p33_p4, %s3224_s15), 0  ;;  %378 = sbr.rel (%p375_p3) target bundleno = 789 (0x315), region = 56 }
   0xa   : > { %s2193_s21 = sadd.s32 (!%p375_p3), 4294967295, %s2192_s18  ;;  %2370 = vmatprep.subr.bf16.mxu0 (!%p375_p3), %v2582_v0  ;;  %v2585_v3 = vld [vmem:[%s3184_s3 + $0x18] sm:$0xff] (!%p375_p3)   ;;  %s2197_s27 = sshll.u32 (!%p375_p3), %s2628_s30, 3  ;;  %v2592_v10 = vld [vmem:[%s3185_s4 + $0x8] sm:$0xff] (!%p375_p3)   ;;  %v2786_v12 = vld [vmem:[%s3185_s4] sm:$0xff] (!%p375_p3)   ;;  %v2795_v15 = vshrl.u32 (!%p375_p3), %v694_v14, 7 }
   0xb   : > { %p446_p5 = scmp.gt.s32.totalorder (!%p375_p3), %s2193_s21, 0  ;;  %2371 = vmatpush3.bf16.msra.mxu0 (!%p375_p3), %v2582_v0  ;;  %p465_p8 = scmp.lt.s32.totalorder (!%p375_p3), %s2197_s27, 31  ;;  %2390 = vmatprep.subr.bf16.mxu1 (!%p375_p3), %v2592_v10  ;;  %v2594_v11 = vld [vmem:[%s3185_s4 + $0x38] sm:$0xff] (!%p375_p3)   ;;  %v2792_v13 = vld [vmem:[%s3185_s4 + $0x30] sm:$0xff] (!%p375_p3)   ;;  %v2802_v18 = vld [vmem:[%s3187_s6] ss:$0 sm:$0xff] (!%p375_p3) }
   0xc   : > { %2372 = vmatprep.subr.bf16.mxu0 (!%p375_p3), %v2583_v1  ;;  %s473_s29 = sadd.s32 (!%p375_p3), 4, %s2192_s18  ;;  %2391 = vmatpush3.bf16.msra.mxu1 (!%p375_p3), %v2592_v10  ;;  %v697_v16 = vadd.s32 (!%p375_p3), 16, %v2795_v15  ;;  %v696_v17 = vadd.s32 (!%p375_p3), 8, %v2795_v15  ;;  %v698_v20 = vadd.s32 (!%p375_p3), 24, %v2795_v15  ;;  %v699_v21 = vadd.s32 (!%p375_p3), 32, %v2795_v15  ;;  %v2971_v50 = vld [vmem:[%s3185_s4 + $0x40] sm:$0xff] (!%p375_p3)  }
   0xd   : > { %p474_p9 = scmp.lt.s32.totalorder (!%p375_p3), %s473_s29, 15  ;;  %2400 = vmatprep.subr.bf16.mxu1 (!%p375_p3), %v2786_v12  ;;  %v701_v22 = vadd.s32 (!%p375_p3), 48, %v2795_v15  ;;  %vm875_vm1 = vcmp.lt.s32.totalorder (!%p375_p3), %v2795_v15, 1  ;;  %v2809_v25 = vadd.s32 (!%p375_p3), 56, %v2795_v15  ;;  %v2812_v26 = vadd.s32 (!%p375_p3), 40, %v2795_v15  ;;  %p1015_p11 = scmp.gt.s32.totalorder (!%p375_p3), %s2628_s30, 0 }
   0xe   : > { %v725_v19 = vand.u32 (!%p375_p3), 15, %v697_v16  ;;  %v718_v23 = vand.u32 (!%p375_p3), 15, %v696_v17  ;;  %vm948_vm2 = vcmp.lt.s32.totalorder (!%p375_p3), %v2795_v15, 7  ;;  %vm1066_vm3 = vcmask (!%p375_p3), 130048   ;;  %p1035_p12 = scmp.lt.s32.totalorder (!%p375_p3), %s2628_s30, 3 }
   0xf   : > { %2373 = vmatpush3.bf16.msra.mxu0 (!%p375_p3), %v2583_v1  ;;  %v2817_v29 = vadd.s32 (!%p375_p3), 64, %v2795_v15  ;;  %v732_v33 = vand.u32 (!%p375_p3), 15, %v698_v20  ;;  %v739_v34 = vand.u32 (!%p375_p3), 15, %v699_v21  ;;  %v753_v38 = vand.u32 (!%p375_p3), 15, %v701_v22 }
  0x10   : > { %s3228_s21 = smov (!%p446_p5, %s2193_s21), 0  ;;  %s3230_s10 = smov (!%p449_p6, %s2632_s10), 1  ;;  %2374 = vmatprep.subr.bf16.mxu0 %v2584_v2  ;;  %vm2820_vm4 = vcmp.ge.s32.totalorder %v725_v19, 1  ;;  %vm2825_vm5 = vcmp.lt.s32.totalorder %v718_v23, 15  ;;  %v760_v42 = vand.u32 15, %v2809_v25  ;;  %v746_v43 = vand.u32 15, %v2812_v26 }
  0x11   : > { %s2194_s26 = sshll.u32 %s3228_s21, 1  ;;  %s2742_s28 = sshll.u32 %s3230_s10, 5  ;;  %v711_v45 = vand.u32 15, %v2795_v15  ;;  %v767_v46 = vand.u32 15, %v2817_v29  ;;  %v2839_v47 = vadd.s32 80, %v2795_v15  ;;  %vm2841_vm6 = vcmp.lt.s32.totalorder %v732_v33, 15 }
  0x12   : > { %p451_p7 = scmp.lt.s32.totalorder %s2194_s26, 31  ;;  %s3234_s27 = smov (!%p465_p8, %s2197_s27), 31  ;;  %v2846_v51 = vadd.s32 72, %v2795_v15  ;;  %v2849_v52 = vadd.s32 88, %v2795_v15  ;;  %vm2858_vm7 = vcmp.ge.s32.totalorder %v753_v38, 1  ;;  %vm2879_vm8 = vcmp.ge.s32.totalorder %v739_v34, 1 }
  0x13   : > { %2375 = vmatpush3.bf16.msra.mxu0 %v2584_v2  ;;  %s468_s19 = sadd.s32 %s2742_s28, %s3234_s27  ;;  %s3236_s29 = smov (!%p474_p9, %s473_s29), 15  ;;  %vm2921_vm9 = vcmp.lt.s32.totalorder %v760_v42, 15  ;;  %vm2933_vm10 = vcmp.ge.s32.totalorder %v711_v45, 1  ;;  %vm2937_vm11 = vcmp.ge.s32.totalorder %v767_v46, 1  ;;  %vm2964_vm13 = vcmp.lt.s32.totalorder %v746_v43, 15  ;;  %v2599_v15 = vld [vmem:[%s3185_s4 + $0x18] sm:$0xff]  }
  0x14   : > { %s3232_s26 = smov (!%p451_p7, %s2194_s26), 31  ;;  %2376 = vmatprep.subr.bf16.mxu0 %v2585_v3  ;;  %s2749_s23 = sshll.u32 %s468_s19, 2  ;;  %v788_v32 = vand.u32 15, %v2849_v52 }
  0x15   : > { %s454_s16 = sadd.s32 %s2742_s28, %s3232_s26  ;;  %s470_s18 = scalar_lea.vmem %s3182_s1, %s2749_s23 }
  0x16   : > { %s2196_s17 = sshll.u32 %s454_s16, 2  ;;  %v2755_v5 = vld [vmem:[%s470_s18] sm:$0xff]   ;;  %v2757_v6 = vld [vmem:[%s470_s18 + $0x8] sm:$0xff]   ;;  %s2201_s25 = sshll.u32 %s3236_s29, 1  ;;  %v2764_v7 = vld [vmem:[%s470_s18 + $0x10] sm:$0xff]   ;;  %vm3004_vm15 = vcmp.lt.s32.totalorder %v788_v32, 15 }
  0x17   : > { %s456_s22 = scalar_lea.vmem %s3181_s0, %s2196_s17  ;;  %2377 = vmatpush3.bf16.msra.mxu0 %v2585_v3  ;;  %p479_p10 = scmp.lt.s32.totalorder %s2201_s25, 31  ;;  %v2766_v8 = vld [vmem:[%s470_s18 + $0x18] sm:$0xff]  }
  0x18   : > { %v2586_v4 = vld [vmem:[%s456_s22] sm:$0xff]   ;;  %2450 = vmatprep.subr.bf16.mxu0 %v2594_v11  ;;  %s3144_s20 = scalar_lea.vmem %s3190_s9, %s2749_s23 }
  0x19   : > { %2378 = vmatprep.mubr.msk.bf16.mxu0 %vm582_vm0, %v2586_v4  ;;  %s3238_s25 = smov (!%p479_p10, %s2201_s25), 31  ;;  %v2873_v4 = vld [vmem:[%s3185_s4 + $0x10] sm:$0xff]  }
  0x1a   : > { %2379 = vmatmul.mubr.msk.bf16.vlgmr.msra.gmra.mrb[0].mxu0 %vm582_vm0, %v2755_v5  ;;  %s482_s26 = sadd.s32 %s2742_s28, %s3238_s25 }
  0x1b   : > { %2382 = vmatprep.mubr.msk.bf16.mxu0 %vm582_vm0, %v2757_v6  ;;  %s2203_s27 = sshll.u32 %s482_s26, 2  ;;  %2451 = vmatpush3.bf16.msra.mxu0 %v2594_v11 }
  0x1c   : > { %s484_s19 = scalar_lea.vmem %s3183_s2, %s2203_s27  ;;  %2460 = vmatprep.subr.bf16.mxu0 %v2792_v13 }
  0x1d   : > { %v2591_v9 = vld [vmem:[%s484_s19] sm:$0xff]   ;;  %s1024_s25 = scalar_select %p1015_p11, 1, 0 }
  0x1e   : > { %s1044_s26 = scalar_select %p1035_p12, 1, 0 }
  0x22   : > { %2383 = vmatmul.mubr.msk.bf16.gmra.mrb[4].mxu0 %vm582_vm0, %v2764_v7 }
  0x23   : > { %2386 = vmatprep.mubr.msk.bf16.mxu0 %vm582_vm0, %v2766_v8 }
  0x2a   : > { %2387 = vmatmul.mubr.msk.bf16.gmra.mrb[8].mxu0 %vm582_vm0, %v2591_v9 }
  0xed   : > { %v2380_v24 = vpop.f32.mrb[0].mxu0 }
  0xee   : > { %v644_v27 = vadd.f32 %v2380_v24, %v2802_v18  ;;  %v635_v28 = vpop.f32.mrb[1].mxu0 }
  0xef   : > { %v636_v30 = vadd.f32 %v2802_v18, %v635_v28  ;;  %v2381_v31 = vpop.f32.mrb[2].mxu0 }
  0xf0   : > { %v684_v35 = vmax.f32 %v644_v27, 0.0  ;;  %v647_v36 = vadd.f32 %v2381_v31, %v2802_v18  ;;  %v638_v37 = vpop.f32.mrb[3].mxu0  ;;  %v781_v31 = vand.u32 15, %v2839_v47 }
  0xf1   : > { %v2829_v40 = vmax.f32 %v636_v30, 0.0  ;;  %v639_v41 = vadd.f32 %v2802_v18, %v638_v37 }
  0xf2   : > { %v2834_v44 = vmax.f32 %v647_v36, 0.0  ;;  %v865_v48 = vrot.slane %v684_v35, 7  ;;  %v938_v53 = vrot.slane %v684_v35, 1  ;;  %v774_v36 = vand.u32 15, %v2846_v51 }
  0xf3   : > { %v683_v49 = vmax.f32 %v639_v41, 0.0  ;;  %v863_v57 = vrot.slane %v2829_v40, 7  ;;  %v936_v63 = vrot.slane %v2829_v40, 1  ;;  %vm2958_vm12 = vcmp.ge.s32.totalorder %v781_v31, 1 }
  0xf4   : > { %v866_v54 = vrot.slane %v2834_v44, 7  ;;  %v939_v55 = vrot.slane %v2834_v44, 1  ;;  %v2854_v56 = vpack.c.bf16 %v2834_v44, %v684_v35  ;;  %vm2983_vm14 = vcmp.lt.s32.totalorder %v774_v36, 15 }
  0xf5   : > { %v864_v58 = vrot.slane %v683_v49, 7  ;;  %v937_v59 = vrot.slane %v683_v49, 1  ;;  %v2384_v60 = vpop.f32.mrb[4].mxu0  ;;  %v997_v61 = vpack.c.bf16 %v683_v49, %v2829_v40  ;;  %v2600_v40 = vld [vmem:[%s3185_s4 + $0x28] sm:$0xff]  }
  0xf6   : > { %v884_v0 = vsel %vm875_vm1, %v865_v48, %v866_v54  ;;  %v957_v1 = vsel %vm948_vm2, %v938_v53, %v939_v55  ;;  %v660_v2 = vadd.f32 %v2384_v60, %v2802_v18  ;;  %v651_v3 = vpop.f32.mrb[5].mxu0 }
  0xf7   : > { %v885_v9 = vsel %vm875_vm1, %v864_v58, %v865_v48  ;;  %v652_v10 = vadd.f32 %v2802_v18, %v651_v3  ;;  %v2385_v11 = vpop.f32.mrb[6].mxu0  ;;  %2392 = vmatprep.mubr.msk.bf16.mxu1 %vm1066_vm3, %v997_v61  ;;  %v2887_v16 = vsel %vm875_vm1, %v863_v57, %v864_v58  ;;  %v958_v17 = vsel %vm948_vm2, %v937_v59, %v938_v53 }
  0xf8   : > { %v914_v19 = vsel %vm2820_vm4, %v885_v9, 0.0  ;;  %v2893_v20 = vmax.f32 %v660_v2, 0.0  ;;  %v663_v21 = vadd.f32 %v2385_v11, %v2802_v18  ;;  %v654_v22 = vpop.f32.mrb[7].mxu0  ;;  %2393 = vmatmul.mubr.msk.bf16.vlgmr.msra.gmra.mrb[0].mxu1 %vm1066_vm3, %v2854_v56  ;;  %v959_v23 = vsel %vm948_vm2, %v936_v63, %v937_v59 }
  0xf9   : > { %v2902_v24 = vpack.c.bf16 %v884_v0, %v914_v19  ;;  %v2904_v25 = vmax.f32 %v652_v10, 0.0  ;;  %v655_v27 = vadd.f32 %v2802_v18, %v654_v22  ;;  %2401 = vmatpush3.bf16.msra.mxu1 %v2786_v12  ;;  %v986_v28 = vsel %vm2825_vm5, %v958_v17, 0.0 }
  0xfa   : > { %v2910_v29 = vmax.f32 %v663_v21, 0.0  ;;  %2410 = vmatprep.subr.bf16.mxu1 %v2873_v4  ;;  %v2913_v30 = vpack.c.bf16 %v986_v28, %v959_v23  ;;  %v869_v33 = vrot.slane %v2893_v20, 7  ;;  %v942_v37 = vrot.slane %v2893_v20, 1 }
  0xfb   : > { %v940_v34 = vrot.slane %v2904_v25, 1  ;;  %v2919_v35 = vmax.f32 %v655_v27, 0.0  ;;  %v867_v48 = vrot.slane %v2904_v25, 7 }
  0xfc   : > { %v870_v38 = vrot.slane %v2910_v29, 7  ;;  %v943_v39 = vrot.slane %v2910_v29, 1  ;;  %v2931_v41 = vpack.c.bf16 %v2910_v29, %v2893_v20 }
  0xfd   : > { %v956_v49 = vsel %vm948_vm2, %v939_v55, %v940_v34  ;;  %v868_v51 = vrot.slane %v2919_v35, 7  ;;  %v2949_v52 = vpack.c.bf16 %v2919_v35, %v2904_v25  ;;  %v2388_v45 = vpop.f32.mrb[8].mxu0  ;;  %v941_v3 = vrot.slane %v2919_v35, 1 }
  0xfe   : > { %v988_v46 = vsel %vm2841_vm6, %v956_v49, 0.0  ;;  %v880_v53 = vsel %vm875_vm1, %v869_v33, %v870_v38  ;;  %v953_v58 = vsel %vm948_vm2, %v942_v37, %v943_v39  ;;  %v676_v59 = vadd.f32 %v2388_v45, %v2802_v18  ;;  %v667_v60 = vpop.f32.mrb[9].mxu0 }
  0xff   : > { %v2973_v0 = vpack.c.bf16 %v988_v46, %v957_v1  ;;  %v881_v2 = vsel %vm875_vm1, %v868_v51, %v869_v33  ;;  %v668_v9 = vadd.f32 %v2802_v18, %v667_v60  ;;  %v2389_v10 = vpop.f32.mrb[10].mxu0  ;;  %2396 = vmatprep.mubr.msk.bf16.mxu1 %vm1066_vm3, %v2949_v52  ;;  %2452 = vmatprep.mubr.msk.bf16.mxu0 %vm1066_vm3, %v2949_v52 }
 0x100   : > { %v918_v43 = vsel %vm2858_vm7, %v881_v2, 0.0  ;;  %v692_v1 = vmax.f32 %v676_v59, 0.0  ;;  %v679_v11 = vadd.f32 %v2389_v10, %v2802_v18  ;;  %v670_v17 = vpop.f32.mrb[11].mxu0  ;;  %2397 = vmatmul.mubr.msk.bf16.gmra.mrb[4].mxu1 %vm1066_vm3, %v2931_v41  ;;  %2453 = vmatmul.mubr.msk.bf16.vlgmr.msra.gmra.mrb[12].mxu0 %vm1066_vm3, %v2931_v41  ;;  %v882_v19 = vsel %vm875_vm1, %v867_v48, %v868_v51 }
 0x101   : > { %v2996_v20 = vpack.c.bf16 %v880_v53, %v918_v43  ;;  %v690_v21 = vmax.f32 %v668_v9, 0.0  ;;  %v671_v22 = vadd.f32 %v2802_v18, %v670_v17  ;;  %v883_v62 = vsel %vm875_vm1, %v866_v54, %v867_v48  ;;  %2461 = vmatpush3.bf16.msra.mxu0 %v2792_v13 }
 0x102   : > { %v873_v27 = vrot.slane %v692_v1, 7  ;;  %v946_v28 = vrot.slane %v692_v1, 1  ;;  %v693_v29 = vmax.f32 %v679_v11, 0.0  ;;  %v916_v31 = vsel %vm2879_vm8, %v883_v62, 0.0  ;;  %2470 = vmatprep.subr.bf16.mxu0 %v2971_v50 }
 0x103   : > { %v871_v18 = vrot.slane %v690_v21, 7  ;;  %v944_v33 = vrot.slane %v690_v21, 1  ;;  %v691_v44 = vmax.f32 %v671_v22, 0.0  ;;  %v3011_v35 = vpack.c.bf16 %v882_v19, %v916_v31 }
 0x104   : > { %v874_v54 = vrot.slane %v693_v29, 7  ;;  %v947_v36 = vrot.slane %v693_v29, 1  ;;  %v1002_v13 = vpack.c.bf16 %v693_v29, %v692_v1  ;;  %v954_v32 = vsel %vm948_vm2, %v941_v3, %v942_v37  ;;  %v2285_v29 = vld [vmem:[%s3188_s7] ss:$0 sm:$0xff] }
 0x105   : > { %v952_v48 = vsel %vm948_vm2, %v943_v39, %v944_v33  ;;  %v872_v49 = vrot.slane %v691_v44, 7  ;;  %v945_v51 = vrot.slane %v691_v44, 1  ;;  %v1001_v14 = vpack.c.bf16 %v691_v44, %v690_v21 }
 0x106   : > { %v992_v45 = vsel %vm2921_vm9, %v952_v48, 0.0  ;;  %v887_v46 = vsel %vm875_vm1, %v874_v54, %v863_v57  ;;  %v879_v53 = vsel %vm875_vm1, %v870_v38, %v871_v18  ;;  %v876_v37 = vsel %vm875_vm1, %v873_v27, %v874_v54 }
 0x107   : > { %v1012_v59 = vpack.c.bf16 %v992_v45, %v953_v58  ;;  %2456 = vmatprep.mubr.msk.bf16.mxu0 %vm1066_vm3, %v1001_v14  ;;  %v912_v39 = vsel %vm2933_vm10, %v887_v46, 0.0  ;;  %v878_v12 = vsel %vm875_vm1, %v871_v18, %v872_v49  ;;  %v920_v60 = vsel %vm2937_vm11, %v879_v53, 0.0 }
 0x108   : > { %2457 = vmatmul.mubr.msk.bf16.gmra.mrb[16].mxu0 %vm1066_vm3, %v1002_v13  ;;  %v1003_v57 = vpack.c.bf16 %v2887_v16, %v912_v39  ;;  %v1007_v38 = vpack.c.bf16 %v878_v12, %v920_v60  ;;  %v877_v2 = vsel %vm875_vm1, %v872_v49, %v873_v27  ;;  %v955_v47 = vsel %vm948_vm2, %v940_v34, %v941_v3  ;;  %v2597_v16 = vld [vmem:[%s3185_s4 + $0x20] sm:$0xff]  }
 0x109   : > { %2462 = vmatprep.mubr.msk.bf16.mxu0 %vm1066_vm3, %v3011_v35  ;;  %v922_v42 = vsel %vm2958_vm12, %v877_v2, 0.0  ;;  %v990_v58 = vsel %vm2964_vm13, %v954_v32, 0.0  ;;  %v950_v9 = vsel %vm948_vm2, %v945_v51, %v946_v28  ;;  %v951_v25 = vsel %vm948_vm2, %v944_v33, %v945_v51 }
 0x10a   : > { %2402 = vmatprep.mubr.msk.bf16.mxu1 %vm1066_vm3, %v1003_v57  ;;  %v1008_v34 = vpack.c.bf16 %v876_v37, %v922_v42  ;;  %v1011_v3 = vpack.c.bf16 %v990_v58, %v955_v47  ;;  %v994_v55 = vsel %vm2983_vm14, %v950_v9, 0.0  ;;  %v949_v61 = vsel %vm948_vm2, %v946_v28, %v947_v36 }
 0x10b   : > { %2403 = vmatmul.mubr.msk.bf16.vlgmr.msra.gmra.mrb[0].mxu1 %vm1066_vm3, %v2902_v24  ;;  %v1013_v10 = vpack.c.bf16 %v994_v55, %v951_v25  ;;  %v960_v43 = vsel %vm948_vm2, %v947_v36, %v936_v63  ;;  %v1025_v21 = vstv %s1024_s25  ;;  %v1045_v28 = vstv %s1044_s26 }
 0x10c   : > { %2411 = vmatpush3.bf16.msra.mxu1 %v2873_v4  ;;  %2406 = vmatprep.mubr.msk.bf16.mxu1 %vm1066_vm3, %v3011_v35  ;;  %v996_v26 = vsel %vm3004_vm15, %v960_v43, 0.0  ;;  %vm1026_vm0 = vcmp.eq.s32.totalorder %v1025_v21, 1  ;;  %vm3121_vm1 = vcmp.eq.s32.totalorder %v1045_v28, 1  ;;  %vm2046_vm2 = vcmask 519168  }
 0x10d   : > { %2420 = vmatprep.subr.bf16.mxu1 %v2597_v16  ;;  %v1014_v1 = vpack.c.bf16 %v996_v26, %v949_v61  ;;  %v1997_v32 = vunpack.c.h.bf16 %v2766_v8 }
 0x110   : > { %2463 = vmatmul.mubr.msk.bf16.vlgmr.msra.gmra.mrb[12].mxu0 %vm1066_vm3, %v2996_v20 }
 0x111   : > { %2466 = vmatprep.mubr.msk.bf16.mxu0 %vm1066_vm3, %v1007_v38  ;;  %2471 = vmatpush3.bf16.msra.mxu0 %v2971_v50 }
 0x113   : > { %2407 = vmatmul.mubr.msk.bf16.gmra.mrb[4].mxu1 %vm1066_vm3, %v2996_v20 }
 0x114   : > { %2412 = vmatprep.mubr.msk.bf16.mxu1 %vm1066_vm3, %v2913_v30 }
 0x118   : > { %2467 = vmatmul.mubr.msk.bf16.gmra.mrb[16].mxu0 %vm1066_vm3, %v1008_v34 }
 0x119   : > { %2472 = vmatprep.mubr.msk.bf16.mxu0 %vm1066_vm3, %v1011_v3 }
 0x11b   : > { %2413 = vmatmul.mubr.msk.bf16.vlgmr.msra.gmra.mrb[0].mxu1 %vm1066_vm3, %v2973_v0 }
 0x11c   : > { %2421 = vmatpush3.bf16.msra.mxu1 %v2597_v16  ;;  %2416 = vmatprep.mubr.msk.bf16.mxu1 %vm1066_vm3, %v1011_v3 }
 0x11d   : > { %2430 = vmatprep.subr.bf16.mxu1 %v2599_v15 }
 0x120   : > { %2473 = vmatmul.mubr.msk.bf16.vlgmr.msra.gmra.mrb[12].mxu0 %vm1066_vm3, %v1012_v59 }
 0x121   : > { %2476 = vmatprep.mubr.msk.bf16.mxu0 %vm1066_vm3, %v1013_v10 }
 0x123   : > { %2417 = vmatmul.mubr.msk.bf16.gmra.mrb[4].mxu1 %vm1066_vm3, %v1012_v59 }
 0x124   : > { %2422 = vmatprep.mubr.msk.bf16.mxu1 %vm1066_vm3, %v2854_v56  ;;  %v2601_v56 = vld [vmem:[%s3186_s5] sm:$0xff]  }
 0x125   : > { %2480 = vmatprep.subr.bf16.mxu0 %v2601_v56 }
 0x126   : > { %2481 = vmatpush3.bf16.msra.mxu0 %v2601_v56 }
 0x128   : > { %2477 = vmatmul.mubr.msk.bf16.gmra.mrb[16].mxu0 %vm1066_vm3, %v1014_v1 }
 0x12b   : > { %2423 = vmatmul.mubr.msk.bf16.vlgmr.msra.gmra.mrb[8].mxu1 %vm1066_vm3, %v2949_v52 }
 0x12c   : > { %2431 = vmatpush3.bf16.msra.mxu1 %v2599_v15  ;;  %2426 = vmatprep.mubr.msk.bf16.mxu1 %vm1066_vm3, %v2931_v41 }
 0x12d   : > { %2440 = vmatprep.subr.bf16.mxu1 %v2600_v40 }
 0x133   : > { %2427 = vmatmul.mubr.msk.bf16.gmra.mrb[4].mxu1 %vm1066_vm3, %v1001_v14 }
 0x134   : > { %2432 = vmatprep.mubr.msk.bf16.mxu1 %vm1066_vm3, %v2902_v24 }
 0x13b   : > { %2433 = vmatmul.mubr.msk.bf16.vlgmr.msra.gmra.mrb[8].mxu1 %vm1066_vm3, %v3011_v35 }
 0x13c   : > { %2441 = vmatpush3.bf16.msra.mxu1 %v2600_v40  ;;  %2436 = vmatprep.mubr.msk.bf16.mxu1 %vm1066_vm3, %v2996_v20 }
 0x143   : > { %2437 = vmatmul.mubr.msk.bf16.gmra.mrb[4].mxu1 %vm1066_vm3, %v1007_v38 }
 0x144   : > { %2442 = vmatprep.mubr.msk.bf16.mxu1 %vm1066_vm3, %v2973_v0 }
 0x14b   : > { %2443 = vmatmul.mubr.msk.bf16.vlgmr.msra.gmra.mrb[8].mxu1 %vm1066_vm3, %v1011_v3 }
 0x14c   : > { %2446 = vmatprep.mubr.msk.bf16.mxu1 %vm1066_vm3, %v1012_v59 }
 0x153   : > { %2447 = vmatmul.mubr.msk.bf16.gmra.mrb[4].mxu1 %vm1066_vm3, %v1013_v10 }
 0x1ee   : > { %v2414_v63 = vpop.f32.mrb[0].mxu1 }
 0x1ef   : > { %v1282_v4 = vpop.f32.mrb[1].mxu1 }
 0x1f0   : > { %v2415_v24 = vpop.f32.mrb[2].mxu1  ;;  %v1337_v62 = vsel %vm1026_vm0, %v1282_v4, 0.0  ;;  %v1992_v4 = vunpack.c.l.bf16 %v2757_v6 }
 0x1f1   : > { %v1285_v30 = vpop.f32.mrb[3].mxu1 }
 0x1f2   : > { %v1338_v33 = vsel %vm1026_vm0, %v1285_v30, 0.0  ;;  %v1990_v30 = vunpack.c.l.bf16 %v2755_v5 }
 0x1f3   : > { %v2474_v41 = vpop.f32.mrb[12].mxu0 }
 0x1f4   : > { %v1800_v52 = vpop.f32.mrb[13].mxu0 }
 0x1f5   : > { %v2475_v50 = vpop.f32.mrb[14].mxu0 }
 0x1f6   : > { %v1803_v0 = vpop.f32.mrb[15].mxu0 }
 0x1fb   : > { %v2478_v11 = vpop.f32.mrb[16].mxu0 }
 0x1fc   : > { %v1816_v17 = vpop.f32.mrb[17].mxu0  ;;  %v1861_v46 = vsel %vm3121_vm1, %v2478_v11, 0.0 }
 0x1fd   : > { %v2479_v19 = vpop.f32.mrb[18].mxu0 }
 0x1fe   : > { %v1819_v20 = vpop.f32.mrb[19].mxu0  ;;  %v1862_v57 = vsel %vm3121_vm1, %v2479_v19, 0.0 }
 0x21e   : > { %v2444_v22 = vpop.f32.mrb[8].mxu1 }
 0x21f   : > { %v1594_v23 = vadd.f32 %v2444_v22, %v2414_v63  ;;  %v1553_v27 = vpop.f32.mrb[9].mxu1  ;;  %v2286_v63 = vld [vmem:[%s3189_s8] ss:$0 sm:$0xff] }
 0x220   : > { %v1592_v31 = vadd.f32 %v1553_v27, %v1337_v62  ;;  %v2445_v18 = vpop.f32.mrb[10].mxu1 }
 0x221   : > { %v1865_v44 = vadd.f32 %v2474_v41, %v1594_v23  ;;  %v1595_v35 = vadd.f32 %v2445_v18, %v2415_v24  ;;  %v1556_v54 = vpop.f32.mrb[11].mxu1 }
 0x222   : > { %v1863_v36 = vadd.f32 %v1800_v52, %v1592_v31  ;;  %v1593_v13 = vadd.f32 %v1556_v54, %v1338_v33 }
 0x223   : > { %v1880_v48 = vadd.f32 %v2285_v29, %v1865_v44  ;;  %v1866_v49 = vadd.f32 %v2475_v50, %v1595_v35  ;;  %v1993_v50 = vunpack.c.h.bf16 %v2757_v6  ;;  %v1994_v35 = vunpack.c.l.bf16 %v2764_v7 }
 0x224   : > { %v1878_v51 = vadd.f32 %v2285_v29, %v1863_v36  ;;  %v1864_v14 = vadd.f32 %v1803_v0, %v1593_v13 }
 0x225   : > { %v1881_v45 = vadd.f32 %v2285_v29, %v1866_v49  ;;  %v1888_v59 = vmax.f32 %v1880_v48, 0.0 }
 0x226   : > { %v1879_v53 = vadd.f32 %v2285_v29, %v1864_v14  ;;  %v2448_v37 = vpop.f32.mrb[4].mxu1  ;;  %v1886_v38 = vmax.f32 %v1878_v51, 0.0  ;;  %v1995_v14 = vunpack.c.h.bf16 %v2764_v7 }
 0x227   : > { %v1889_v39 = vmax.f32 %v1881_v45, 0.0  ;;  %v1869_v12 = vadd.f32 %v2448_v37, %v1861_v46  ;;  %v1569_v60 = vpop.f32.mrb[5].mxu1 }
 0x228   : > { %v1887_v2 = vmax.f32 %v1879_v53, 0.0  ;;  %v1867_v47 = vadd.f32 %v1816_v17, %v1569_v60  ;;  %v2449_v42 = vpop.f32.mrb[6].mxu1  ;;  %v1991_v17 = vunpack.c.h.bf16 %v2755_v5  ;;  %v1996_v5 = vunpack.c.l.bf16 %v2766_v8 }
 0x229   : > { %v1895_v58 = vpack.c.bf16 %v1889_v39, %v1888_v59  ;;  %v1884_v16 = vadd.f32 %v2285_v29, %v1869_v12  ;;  %v1870_v9 = vadd.f32 %v2449_v42, %v1862_v57  ;;  %v1572_v25 = vpop.f32.mrb[7].mxu1 }
 0x22a   : > { %v1894_v34 = vpack.c.bf16 %v1887_v2, %v1886_v38  ;;  %v1882_v3 = vadd.f32 %v2285_v29, %v1867_v47  ;;  %v1868_v55 = vadd.f32 %v1819_v20, %v1572_v25 }
 0x22b   : > { %v1885_v61 = vadd.f32 %v2285_v29, %v1870_v9  ;;  %v1892_v43 = vmax.f32 %v1884_v16, 0.0 }
 0x22c   : > { %v1883_v10 = vadd.f32 %v2285_v29, %v1868_v55  ;;  %2482 = vmatprep.mubr.msk.bf16.mxu0 %vm1066_vm3, %v1894_v34  ;;  %v1890_v1 = vmax.f32 %v1882_v3, 0.0 }
 0x22d   : > { %v1893_v26 = vmax.f32 %v1885_v61, 0.0  ;;  %2483 = vmatmul.mubr.msk.bf16.vlgmr.msra.gmra.mrb[20].mxu0 %vm1066_vm3, %v1895_v58 }
 0x22e   : > { %v1891_v15 = vmax.f32 %v1883_v10, 0.0 }
 0x22f   : > { %v1897_v40 = vpack.c.bf16 %v1893_v26, %v1892_v43 }
 0x230   : > { %v1896_v56 = vpack.c.bf16 %v1891_v15, %v1890_v1 }
 0x232   : > { %2486 = vmatprep.mubr.msk.bf16.mxu0 %vm1066_vm3, %v1896_v56 }
 0x235   : > { %2487 = vmatmul.mubr.msk.bf16.gmra.mrb[24].mxu0 %vm1066_vm3, %v1897_v40 }
 0x300   : > { %v2484_v24 = vpop.f32.mrb[20].mxu0 }
 0x301   : > { %v1968_v41 = vadd.f32 %v2484_v24, %v2286_v63  ;;  %v1959_v52 = vpop.f32.mrb[21].mxu0 }
 0x302   : > { %v1960_v0 = vadd.f32 %v2286_v63, %v1959_v52  ;;  %v2485_v11 = vpop.f32.mrb[22].mxu0 }
 0x303   : > { %v2000_v19 = vadd.f32 %v1992_v4, %v1968_v41  ;;  %v1971_v20 = vadd.f32 %v2485_v11, %v2286_v63  ;;  %v1962_v21 = vpop.f32.mrb[23].mxu0 }
 0x304   : > { %v1998_v22 = vadd.f32 %v1990_v30, %v1960_v0  ;;  %v1963_v62 = vadd.f32 %v2286_v63, %v1962_v21 }
 0x305   : > { %v2008_v23 = vmax.f32 %v2000_v19, 0.0  ;;  %v2001_v27 = vadd.f32 %v1993_v50, %v1971_v20 }
 0x306   : > { %v2006_v6 = vmax.f32 %v1998_v22, 0.0  ;;  %v1999_v28 = vadd.f32 %v1991_v17, %v1963_v62 }
 0x307   : > { %v2304_v29 = vpack.c.bf16 %v2008_v23, %v2008_v23  ;;  %v2009_v31 = vmax.f32 %v2001_v27, 0.0 }
 0x308   : > { %v2302_v18 = vpack.c.bf16 %v2006_v6, %v2006_v6  ;;  %v2007_v33 = vmax.f32 %v1999_v28, 0.0  ;;  %v2488_v44 = vpop.f32.mrb[24].mxu0 }
 0x309   : > { %2049 = vst.msk [vmem:[%s3144_s20 + $0x8] sm:$0xf] %vm2046_vm2, %v2304_v29  ;;  %v2305_v54 = vpack.c.bf16 %v2009_v31, %v2009_v31  ;;  %v1984_v36 = vadd.f32 %v2488_v44, %v2286_v63  ;;  %v1975_v13 = vpop.f32.mrb[25].mxu0 }
 0x30a   : > { %2047 = vst.msk [vmem:[%s3144_s20] sm:$0xf] %vm2046_vm2, %v2302_v18  ;;  %v2303_v48 = vpack.c.bf16 %v2007_v33, %v2007_v33  ;;  %v1976_v49 = vadd.f32 %v2286_v63, %v1975_v13  ;;  %v2489_v51 = vpop.f32.mrb[26].mxu0 }
 0x30b   : > { %2050 = vst.msk [vmem:[%s3144_s20 + $0xc] sm:$0xf] %vm2046_vm2, %v2305_v54  ;;  %v2004_v45 = vadd.f32 %v1996_v5, %v1984_v36  ;;  %v1987_v46 = vadd.f32 %v2489_v51, %v2286_v63  ;;  %v1978_v53 = vpop.f32.mrb[27].mxu0 }
 0x30c   : > { %2048 = vst.msk [vmem:[%s3144_s20 + $0x4] sm:$0xf] %vm2046_vm2, %v2303_v48  ;;  %v2002_v37 = vadd.f32 %v1994_v35, %v1976_v49  ;;  %v1979_v8 = vadd.f32 %v2286_v63, %v1978_v53 }
 0x30d   : > { %v2012_v59 = vmax.f32 %v2004_v45, 0.0  ;;  %v2005_v39 = vadd.f32 %v1997_v32, %v1987_v46 }
 0x30e   : > { %v2010_v12 = vmax.f32 %v2002_v37, 0.0  ;;  %v2003_v60 = vadd.f32 %v1995_v14, %v1979_v8 }
 0x30f   : > { %v2308_v57 = vpack.c.bf16 %v2012_v59, %v2012_v59  ;;  %v2013_v38 = vmax.f32 %v2005_v39, 0.0 }
 0x310   : > { %v2306_v7 = vpack.c.bf16 %v2010_v12, %v2010_v12  ;;  %v2011_v2 = vmax.f32 %v2003_v60, 0.0 }
 0x311   : > { %2053 = vst.msk [vmem:[%s3144_s20 + $0x18] sm:$0xf] %vm2046_vm2, %v2308_v57  ;;  %v2309_v47 = vpack.c.bf16 %v2013_v38, %v2013_v38 }
 0x312   : > { %2051 = vst.msk [vmem:[%s3144_s20 + $0x10] sm:$0xf] %vm2046_vm2, %v2306_v7  ;;  %v2307_v42 = vpack.c.bf16 %v2011_v2, %v2011_v2 }
 0x313   : > { %2054 = vst.msk [vmem:[%s3144_s20 + $0x1c] sm:$0xf] %vm2046_vm2, %v2309_v47 }
 0x314   : > { %2052 = vst.msk [vmem:[%s3144_s20 + $0x14] sm:$0xf] %vm2046_vm2, %v2307_v42 }
 0x315 PF: > { %s19_s13 = sadd.s32 1, %s2644_s13   ;;  %s3217_s30 = smov %s2636_s11 }
 0x316   : > { %p16_p13 = scmp.ge.s32.totalorder %s19_s13, 10   ;;  %s3218_s10 = smov %s2640_s12 }
 0x317   : > { %s3219_s11 = smov %s3222_s14  ;;  %s3220_s12 = smov %s3226_s15 }
 0x318   :  { %18 = sbr.rel (!%p16_p13) target bundleno = 3 (0x3), region = 100 }

</bundles_post_ra>
